<compile_context>
chip_gen: v7x
topology: tpu7x:2x2x1
jax: 0.10.0
libtpu: 0.0.40
codegen_flags: <defaults>
</compile_context>

<pallas_src>
import jax
import jax.numpy as jnp
from jax.experimental import pallas as pl
from jax.experimental.pallas import tpu as pltpu

_LANES = 128      # vreg lane width
_SUBLANES = 8     # vreg sublane count (f32)


# ----------------------------------------------------------------------------
# Pallas kernel: BCEWithLogitsLoss, reduction='none'
#   loss = max(x, 0) - x * t + log1p(exp(-|x|))       (numerically stable)
# ----------------------------------------------------------------------------
def _bce_with_logits_kernel(logits_ref, targets_ref, out_ref):
    x = logits_ref[...].astype(jnp.float32)
    t = targets_ref[...].astype(jnp.float32)   # targets may arrive as bf16
    pos = jnp.maximum(x, 0.0)
    # stable -[t*log(sigmoid(x)) + (1-t)*log(1-sigmoid(x))]
    out_ref[...] = (pos - x * t + jnp.log1p(jnp.exp(-jnp.abs(x)))).astype(out_ref.dtype)


def bce_with_logits_none(logits: jax.Array, targets: jax.Array,
                         *, tile_rows: int = 2048,
                         out_dtype=jnp.float32) -> jax.Array:
    """Element-wise BCEWithLogitsLoss (reduction='none') via a Pallas kernel.

    Works for any input shape / size: logits and targets (same shape) are
    flattened to a lane-dense (rows, 128) slab (tiny tail pad only), processed
    in (tile_rows, 128) blocks, and reshaped back.  Set out_dtype=jnp.bfloat16
    if the consumer tolerates it to halve the write stream.
    """
    assert logits.shape == targets.shape
    orig_shape = logits.shape
    n = logits.size

    # Flatten (contiguous reshape, no transpose) and pad the flat tail to a
    # multiple of 8*128 so rows is sublane-aligned.  Pad is < 1024 elements.
    chunk = _SUBLANES * _LANES
    n_pad = (-n) % chunk
    lf = logits.reshape(-1)
    tf = targets.reshape(-1)
    if n_pad:
        lf = jnp.pad(lf, (0, n_pad))
        tf = jnp.pad(tf, (0, n_pad))
    rows = (n + n_pad) // _LANES                      # multiple of 8
    l2 = lf.reshape(rows, _LANES)
    t2 = tf.reshape(rows, _LANES)

    # Tile rows: 8-aligned, no larger than the array; partial last block is
    # handled by the cdiv grid (masked stores on the row remainder only; the
    # 128-wide lane axis stays unmasked / lane-dense).
    tr = max(_SUBLANES, (min(tile_rows, rows) // _SUBLANES) * _SUBLANES)
    grid = (pl.cdiv(rows, tr),)
    spec = pl.BlockSpec((tr, _LANES), lambda i: (i, 0))

    out = pl.pallas_call(
        _bce_with_logits_kernel,
        out_shape=jax.ShapeDtypeStruct((rows, _LANES), out_dtype),
        grid_spec=pl.GridSpec(grid=grid, in_specs=[spec, spec], out_specs=spec),
        compiler_params=pltpu.CompilerParams(
            dimension_semantics=("parallel",)),
    )(l2, t2)

    out_flat = out.reshape(-1)
    if n_pad:
        out_flat = out_flat[:n]
    return out_flat.reshape(orig_shape)


# ----------------------------------------------------------------------------
# YoloCriterion: JAX port of the PyTorch module (stateless wrapper)
# ----------------------------------------------------------------------------
class YoloCriterion:
    def __init__(self, args: dict, *, stride, nc: int, dfl_ch: int):
        # Deterministic, in-script "parameter" setup (mirrors __init__).
        self.stride = jnp.asarray(stride, dtype=jnp.float32)
        self.nc = nc
        self.dfl_ch = dfl_ch
        self.no = nc + 4 * dfl_ch
        self.top_k = 10
        self.alpha = 0.5
        self.beta = 6.0
        self.eps = 1e-09
        self.bs = 1
        self.num_max_boxes = 0
        self.classCost = args.get('classCost')
        self.bboxCost = args.get('bboxCost')
        self.dlfCost = args.get('dlfCost')
        # DFL projection vector: arange(dfl_ch)
        self.project = jnp.arange(self.dfl_ch, dtype=jnp.float32)
        # BCEWithLogitsLoss(reduction='none') equivalent, Pallas-backed.
        self.bce = bce_with_logits_none

    def forward(self, x: dict, y: list) -> dict:
        return self.compute_loss(x, y)

    __call__ = forward

    def compute_loss(self, x: dict, y: list) -> dict:
        # Reference implementation is a stub: returns a dict of Nones.
        # TODO(synk): full YOLOv8 task-aligned assignment + CIoU/DFL loss is
        # not present in the reference module, so nothing more to translate.
        return {'classification loss': None, 'bbox loss': None,
                'DFL loss': None, 'mAP': None, 'mAP_50': None,
                'mAP_75': None, 'mAP_95': None}


if __name__ == "__main__":
    key = jax.random.PRNGKey(0)

    # Small, module-consistent shapes: nc=4 classes, dfl_ch=8 -> no = 4 + 32.
    nc, dfl_ch = 4, 8
    criterion = YoloCriterion({'classCost': 0.5, 'bboxCost': 7.5, 'dlfCost': 1.5},
                              stride=[8., 16., 32.], nc=nc, dfl_ch=dfl_ch)

    # Detector outputs (NCHW, like PyTorch): batch=2, channels=no, spatial=16.
    B, H, W = 2, 16, 16
    k1, k2 = jax.random.split(key, 2)
    x = {'p3': jax.random.normal(k1, (B, criterion.no, H, W), jnp.float32)}
    y = [{'boxes': jnp.zeros((0, 4), jnp.float32),
          'labels': jnp.zeros((0,), jnp.int32)} for _ in range(B)]

    # 1) Exact forward semantics of the reference module (dict of Nones).
    out = criterion(x, y)
    assert set(out.keys()) == {'classification loss', 'bbox loss', 'DFL loss',
                               'mAP', 'mAP_50', 'mAP_75', 'mAP_95'}
    assert all(v is None for v in out.values())

    # 2) Exercise the Pallas BCEWithLogits hot path on the classification
    #    logits of x['p3'] in their NATIVE layout (no transpose, no 128-lane
    #    class padding).  Targets are built in the same (B, nc, H, W) layout,
    #    as bf16 (binary -> lossless), halving that input stream.
    cls_logits = x['p3'][:, :nc, :, :]                          # (B, nc, H, W)
    targets = (jax.random.uniform(k2, cls_logits.shape) > 0.8).astype(jnp.bfloat16)

    loss = criterion.bce(cls_logits, targets)                   # (B, nc, H, W) f32
    loss = jax.block_until_ready(loss)

    # Reference check in plain JAX.
    t32 = targets.astype(jnp.float32)
    ref = jnp.maximum(cls_logits, 0) - cls_logits * t32 + \
        jnp.log1p(jnp.exp(-jnp.abs(cls_logits)))
    assert loss.shape == cls_logits.shape
    assert jnp.allclose(loss, ref, atol=1e-5, rtol=1e-5)

    print("KERNEL_OK")
</pallas_src>

<mosaic_0001>
module attributes {stable_mosaic.version = 11 : i64} {
  func.func @_bce_with_logits_kernel(%arg0: i32, %arg1: memref<16x128xf32, #tpu.memory_space<vmem>>, %arg2: memref<16x128xbf16, #tpu.memory_space<vmem>>, %arg3: memref<16x128xf32, #tpu.memory_space<vmem>>) attributes {dimension_semantics = [#tpu.dimension_semantics<parallel>], iteration_bounds = array<i64: 1>, scalar_prefetch = 0 : i64, scratch_operands = 0 : i64, tpu.core_type = #tpu.core_type<tc>, window_params = [{transform_indices = @transform_0, window_bounds = array<i64: 16, 128>}, {transform_indices = @transform_1, window_bounds = array<i64: 16, 128>}, {transform_indices = @transform_2, window_bounds = array<i64: 16, 128>}]} {
    %c0 = arith.constant 0 : index
    %c0_0 = arith.constant 0 : index
    %0 = vector.load %arg1[%c0, %c0_0] : memref<16x128xf32, #tpu.memory_space<vmem>>, vector<16x128xf32>
    %c0_1 = arith.constant 0 : index
    %c0_2 = arith.constant 0 : index
    %1 = vector.load %arg2[%c0_1, %c0_2] : memref<16x128xbf16, #tpu.memory_space<vmem>>, vector<16x128xbf16>
    %2 = arith.extf %1 : vector<16x128xbf16> to vector<16x128xf32>
    %cst = arith.constant 0.000000e+00 : f32
    %3 = vector.broadcast %cst : f32 to vector<16x128xf32>
    %4 = arith.maximumf %0, %3 : vector<16x128xf32>
    %5 = arith.mulf %0, %2 : vector<16x128xf32>
    %6 = arith.subf %4, %5 : vector<16x128xf32>
    %7 = math.absf %0 : vector<16x128xf32>
    %cst_3 = arith.constant 0.000000e+00 : f32
    %8 = vector.broadcast %cst_3 : f32 to vector<16x128xf32>
    %9 = arith.subf %8, %7 : vector<16x128xf32>
    %10 = math.exp %9 : vector<16x128xf32>
    %11 = math.log1p %10 : vector<16x128xf32>
    %12 = arith.addf %6, %11 : vector<16x128xf32>
    %c0_4 = arith.constant 0 : index
    %c0_5 = arith.constant 0 : index
    %13 = vector.load %arg3[%c0_4, %c0_5] : memref<16x128xf32, #tpu.memory_space<vmem>>, vector<16x128xf32>
    tpu.vector_store %arg3[%c0_4, %c0_5], %12 {strides = array<i32>} : memref<16x128xf32, #tpu.memory_space<vmem>>, vector<16x128xf32>,
    return
  }
  func.func @transform_0(%arg0: i32) -> (i32, i32) {
    %c0_i32 = arith.constant 0 : i32
    %c0_i32_0 = arith.constant 0 : i32
    return %arg0, %c0_i32 : i32, i32
  }
  func.func @transform_1(%arg0: i32) -> (i32, i32) {
    %c0_i32 = arith.constant 0 : i32
    %c0_i32_0 = arith.constant 0 : i32
    return %arg0, %c0_i32 : i32, i32
  }
  func.func @transform_2(%arg0: i32) -> (i32, i32) {
    %c0_i32 = arith.constant 0 : i32
    %c0_i32_0 = arith.constant 0 : i32
    return %arg0, %c0_i32 : i32, i32
  }
}

</mosaic_0001>

<bundles_post_ra>
// kernel: tpu_custom_call.1
= control target key start
LH: loop header
LB: loop body
LE: loop exit
PB: predicated region body
PF: predicated region fallthrough
CT: control target
= control target key end

     0   :  { %7 = vsyncpa [#allocation3], 0  ;;  %s255_s0 = inlined_call_operand.hbm [shape: f32[16,128], index: 0, kind: input, shape index: {}]   ;;  %s256_s1 = inlined_call_operand.hbm [shape: bf16[16,128], index: 1, kind: input, shape index: {}]   ;;  %s257_s2 = inlined_call_operand.hbm [shape: f32[16,128], index: 2, kind: output, shape index: {}]  }
   0x1   :  { %8 = vsyncpa [#allocation6], 0 }
   0x2   :  { %9 = vsyncpa [#allocation4], 0  ;;  %s191_s9 = smov [#allocation2]   ;;  %s119_s13 = scalar_lea.hbm %s255_s0, 256 }
   0x3   :  { %s15_s10 = sshll.u32 %s191_s9, 4  ;;  %p120_p0 = scmp.ne.s32.totalorder %s255_s0, %s119_s13  ;;  %s16_s10 = int_to_ptr.vmem [resolvable:$true] %s15_s10 }
   0x4   :  { %p123_p1 = scmp.lt.u32.totalorder %s119_s13, %s255_s0 }
   0x6   :  { %p125_p2 = pnand %p123_p1, %p120_p0 }
   0x8   :  { %128 = shalt.err (!%p125_p2)
}
   0x9   :  { %s129_s18 = scalar_lea.vmem %s16_s10, 256  ;;  %p134_p4 = scmp.lt.s32.totalorder %s16_s10, %s16_s10 }
   0xa   :  { %p130_p3 = scmp.ne.s32.totalorder %s16_s10, %s129_s18  ;;  %p135_p5 = scmp.lt.s32.totalorder %s129_s18, %s129_s18 }
   0xc   :  { %p136_p6 = por %p135_p5, %p134_p4 }
   0xe   :  { %p137_p7 = pnand %p136_p6, %p130_p3 }
  0x10   :  { %140 = shalt.err (!%p137_p7)
}
  0x11   :  { %s192_s19 = smov 128   ;;  %s193_s20 = smov 8  }
  0x12   :  { %21 = dma.hbm_to_vmem [thread:$0]  %s255_s0, 256, %s16_s10, [#allocation3], %s192_s19, %s192_s19, %s193_s20  }
  0x13   :  { %s194_s23 = smov [#allocation5]   ;;  %s141_s27 = scalar_lea.hbm %s256_s1, 128 }
  0x14   :  { %s27_s24 = sshll.u32 %s194_s23, 4  ;;  %p142_p8 = scmp.ne.s32.totalorder %s256_s1, %s141_s27  ;;  %s28_s24 = int_to_ptr.vmem [resolvable:$true] %s27_s24 }
  0x15   :  { %p145_p9 = scmp.lt.u32.totalorder %s141_s27, %s256_s1 }
  0x17   :  { %p147_p10 = pnand %p145_p9, %p142_p8 }
  0x19   :  { %150 = shalt.err (!%p147_p10)
}
  0x1a   :  { %s151_s4 = scalar_lea.vmem %s28_s24, 128  ;;  %p156_p12 = scmp.lt.s32.totalorder %s28_s24, %s28_s24 }
  0x1b   :  { %p152_p11 = scmp.ne.s32.totalorder %s28_s24, %s151_s4  ;;  %p157_p13 = scmp.lt.s32.totalorder %s151_s4, %s151_s4 }
  0x1d   :  { %p158_p0 = por %p157_p13, %p156_p12 }
  0x1f   :  { %p159_p1 = pnand %p158_p0, %p152_p11 }
  0x21   :  { %162 = shalt.err (!%p159_p1)
}
  0x22   :  { %s195_s0 = smov 64   ;;  %s196_s5 = smov 4  }
  0x23   :  { %33 = dma.hbm_to_vmem [thread:$0]  %s256_s1, 128, %s28_s24, [#allocation6], %s195_s0, %s195_s0, %s196_s5  }
  0x24   :  { %185 = dma.done.wait [#allocation3], 256  }
  0x25   :  { %186 = vsyncadd [#allocation3], 4294967040 }
  0x26   :  { %187 = dma.done.wait [#allocation6], 128  }
  0x27   :  { %188 = vsyncadd [#allocation6], 4294967168  ;;  %v40_v0 = vld [vmem:[#allocation2] sm:$0xff]  ;;  %v41_v1 = vld [vmem:[#allocation2 + $0x8] sm:$0xff]  ;;  %s197_s1 = smov [#allocation7]  }
  0x28   :  { %v52_v2 = vand.u32 2147483647, %v40_v0  ;;  %v53_v3 = vand.u32 2147483647, %v41_v1  ;;  %v101_v11 = vld [vmem:[#allocation5] sm:$0xff]   ;;  %v46_v18 = vmax.f32 %v40_v0, 0.0 }
  0x29   :  { %v102_v14 = vunpack.c.l.bf16 %v101_v11  ;;  %v103_v16 = vunpack.c.h.bf16 %v101_v11  ;;  %v47_v22 = vmax.f32 %v41_v1, 0.0  ;;  %s87_s8 = sshll.u32 %s197_s1, 4  ;;  %s88_s8 = int_to_ptr.vmem [resolvable:$true] %s87_s8 }
  0x2a   :  { %v54_v4 = vsub.f32 0.0, %v52_v2  ;;  %v55_v5 = vsub.f32 0.0, %v53_v3  ;;  %s163_s9 = scalar_lea.vmem %s88_s8, 256  ;;  %p168_p3 = scmp.lt.s32.totalorder %s88_s8, %s88_s8 }
  0x2b   :  { %v48_v19 = vmul.f32 %v102_v14, %v40_v0  ;;  %v49_v23 = vmul.f32 %v103_v16, %v41_v1  ;;  %p164_p2 = scmp.ne.s32.totalorder %s88_s8, %s163_s9  ;;  %p169_p4 = scmp.lt.s32.totalorder %s163_s9, %s163_s9 }
  0x2c   :  { %v56_v6 = vmul.f32 1.442695, %v54_v4  ;;  %v58_v7 = vmul.f32 1.442695, %v55_v5 }
  0x2d   :  { %v50_v27 = vsub.f32 %v46_v18, %v48_v19  ;;  %v51_v31 = vsub.f32 %v47_v22, %v49_v23  ;;  %p170_p5 = por %p169_p4, %p168_p3 }
  0x2e   :  { %111 = vpow2.f32 %v56_v6 }
  0x2f   :  { %113 = vpow2.f32 %v58_v7  ;;  %p171_p6 = pnand %p170_p5, %p164_p2 }
  0x38   :  { %v112_v8 = vpop.eup %111 }
  0x39   :  { %v114_v9 = vpop.eup %113  ;;  %v60_v10 = vadd.f32 1.0, %v112_v8  ;;  %v63_v13 = vmul.f32 -0.5, %v112_v8  ;;  %v66_v20 = vand.u32 2147483647, %v112_v8 }
  0x3a   :  { %v69_v12 = vadd.f32 1.0, %v114_v9  ;;  %v72_v15 = vmul.f32 -0.5, %v114_v9  ;;  %v75_v24 = vand.u32 2147483647, %v114_v9 }
  0x3b   :  { %115 = vlog2.f32 %v60_v10  ;;  %v64_v17 = vadd.f32 1.0, %v63_v13  ;;  %vm67_vm0 = vcmp.lt.f32.partialorder %v66_v20, 0.0004427343 }
  0x3c   :  { %117 = vlog2.f32 %v69_v12  ;;  %v73_v21 = vadd.f32 1.0, %v72_v15  ;;  %vm76_vm1 = vcmp.lt.f32.partialorder %v75_v24, 0.0004427343 }
  0x3d   :  { %v65_v25 = vmul.f32 %v112_v8, %v64_v17 }
  0x3e   :  { %v74_v28 = vmul.f32 %v114_v9, %v73_v21 }
  0x45   :  { %v116_v26 = vpop.eup %115 }
  0x46   :  { %v118_v29 = vpop.eup %117  ;;  %v62_v30 = vmul.f32 0.6931472, %v116_v26 }
  0x47   :  { %v71_v32 = vmul.f32 0.6931472, %v118_v29 }
  0x48   :  { %v68_v33 = vsel %vm67_vm0, %v65_v25, %v62_v30 }
  0x49   :  { %v78_v34 = vadd.f32 %v68_v33, %v50_v27  ;;  %v77_v35 = vsel %vm76_vm1, %v74_v28, %v71_v32 }
  0x4a   :  { %v79_v36 = vadd.f32 %v77_v35, %v51_v31 }
  0x4b   :  { %80 = vst [vmem:[#allocation7] sm:$0xff] %v78_v34 }
  0x4c   :  { %81 = vst [vmem:[#allocation7 + $0x8] sm:$0xff] %v79_v36 }
  0x4d   :  { %174 = shalt.err (!%p171_p6)
}
  0x4e   :  { %s175_s12 = scalar_lea.hbm %s257_s2, 256 }
  0x4f   :  { %p176_p7 = scmp.ne.s32.totalorder %s257_s2, %s175_s12  ;;  %p179_p8 = scmp.lt.u32.totalorder %s175_s12, %s257_s2 }
  0x51   :  { %p181_p9 = pnand %p179_p8, %p176_p7 }
  0x53   :  { %184 = shalt.err (!%p181_p9)
}
  0x54   :  { %93 = dma.vmem_to_hbm [thread:$0]  %s88_s8, 256, %s257_s2, [#allocation4], %s192_s19, %s192_s19, %s193_s20  }
  0x55   :  { %189 = dma.done.wait [#allocation4], 256  }
  0x56   :  { %190 = vsyncadd [#allocation4], 4294967040 }
  0x57   :  { %97 = vsyncpa [#allocation3], 1 }
  0x58   :  { %98 = vsyncpa [#allocation6], 1 }
  0x59   :  { %99 = vsyncpa [#allocation4], 1 }

</bundles_post_ra>
